<compile_context>
chip_gen: v6e
topology: v6e:2x2x1
jax: 0.10.0
libtpu: 0.0.40
codegen_flags: <defaults>
</compile_context>

<pallas_src>
import jax
import jax.numpy as jnp
from jax.experimental import pallas as pl
from jax.experimental.pallas import tpu as pltpu

LEAKY_SLOPE = 0.01  # nn.LeakyReLU() default negative_slope


def _mp_kernel(x_ref, o_ref):
    # x_ref: (TB, N, TD) input tile; o_ref: (TB, N-1, TD) output tile (VMEM).
    x = x_ref[...]                                              # input dtype
    # f32-accumulated sublane mean only; no full-tile f32 copy is materialized.
    mu = jnp.mean(x, axis=1, keepdims=True, dtype=jnp.float32)  # (TB, 1, TD)
    mu = mu.astype(x.dtype)
    # Fused [:, 1:, :]: only rows 1..N-1 are multiplied / activated / stored.
    adj = x[:, 1:, :] * mu
    adj = jnp.where(adj >= 0, adj, LEAKY_SLOPE * adj)           # LeakyReLU
    # TODO(synk): nn.Dropout is identity in eval mode; training-mode dropout
    # (mask + 1/(1-p) scaling) is not modeled here.
    o_ref[...] = adj.astype(o_ref.dtype)


def _choose_tiles(B, N, D, itemsize, target_tile_bytes):
    """Pick (TB, TD) batch/lane tile sizes. Ragged last tiles are allowed."""
    # --- lane (D) tile -------------------------------------------------------
    if D >= 128:
        # Largest multiple of 128 keeping a single-batch slab under target, but
        # never larger than D rounded down to 128 (the D % 128 remainder is
        # handled by a ragged last lane tile).
        max_td = (target_tile_bytes // max(1, N * itemsize)) // 128 * 128
        TD = int(min(max(128, max_td), (D // 128) * 128))
    else:
        # < 128 lanes: unavoidable masked stores; the wrapper normally routes
        # such shapes to the fused XLA path instead.
        TD = D
    # --- batch tile ----------------------------------------------------------
    per_b = N * TD * itemsize
    TB = int(max(1, min(B, target_tile_bytes // max(1, per_b))))
    grid_b = -(-B // TB)
    grid_d = -(-D // TD)
    # v7x has 2 TensorCores: a (1, 1) grid would idle one of them, so force a
    # 2-way split along a parallel axis when possible.
    if grid_b * grid_d == 1:
        if B >= 2:
            TB = -(-B // 2)
        elif D >= 256:
            TD = max(128, ((-(-D // 2) + 127) // 128) * 128)
    return TB, TD


def _xla_forward(embeddings):
    """Fused XLA path for tiny / narrow-lane (D < 128) inputs."""
    x = embeddings
    mu = jnp.mean(x.astype(jnp.float32), axis=1, keepdims=True).astype(x.dtype)
    adj = x[:, 1:, :] * mu
    adj = jnp.where(adj >= 0, adj, LEAKY_SLOPE * adj)
    return adj.astype(embeddings.dtype)


def base_mp_6_forward(embeddings, *, target_tile_bytes=2 * 1024 * 1024,
                      force_pallas=False):
    """embeddings: (B, N, D) -> (B, N-1, D), same dtype."""
    B, N, D = embeddings.shape
    itemsize = jnp.dtype(embeddings.dtype).itemsize

    # Tiny or narrow-lane inputs (e.g. the module's implied em_dim = 32): a
    # Pallas kernel cannot store lane-dense and per-step overhead dominates, so
    # let XLA fuse the elementwise chain instead.
    if not force_pallas and (D < 128 or B * N * D * itemsize < (256 << 10)):
        return _xla_forward(embeddings)

    TB, TD = _choose_tiles(B, N, D, itemsize, target_tile_bytes)
    grid = (pl.cdiv(B, TB), pl.cdiv(D, TD))

    # Explicit VMEM budget: 2x double-buffered input + output tiles plus f32
    # headroom for the reduction / intermediates, capped safely for all chips.
    in_tile = TB * N * TD * itemsize
    out_tile = TB * (N - 1) * TD * itemsize
    budget = 2 * in_tile + 2 * out_tile + 3 * TB * N * TD * 4 + (1 << 20)
    vmem_limit = int(min(max(budget, 4 << 20), 32 << 20))

    cost = pl.CostEstimate(
        flops=B * N * D + 3 * B * (N - 1) * D,      # mean adds + mul/cmp/select
        transcendentals=0,
        bytes_accessed=(B * N * D + B * (N - 1) * D) * itemsize,
    )

    return pl.pallas_call(
        _mp_kernel,
        out_shape=jax.ShapeDtypeStruct((B, N - 1, D), embeddings.dtype),
        grid=grid,
        in_specs=[pl.BlockSpec((TB, N, TD), lambda b, d: (b, 0, d))],
        out_specs=pl.BlockSpec((TB, N - 1, TD), lambda b, d: (b, 0, d)),
        compiler_params=pltpu.CompilerParams(
            dimension_semantics=("parallel", "parallel"),
            vmem_limit_bytes=vmem_limit,
        ),
        cost_estimate=cost,
    )(embeddings)


def _reference(embeddings):
    x = embeddings.astype(jnp.float32)
    mu = jnp.mean(x, axis=1, keepdims=True)
    adj = x * mu
    adj = jnp.where(adj >= 0, adj, LEAKY_SLOPE * adj)
    return adj[:, 1:, :].astype(embeddings.dtype)


if __name__ == "__main__":
    key = jax.random.PRNGKey(0)
    k1, k2, k3 = jax.random.split(key, 3)

    # 1) Module-implied tiny shape (batch=2, nodes=8, em_dim=32): force the
    #    Pallas path to verify the kernel itself, then check the default
    #    dispatch (fused XLA for D < 128) agrees.
    B, N, D = 2, 8, 32
    emb = jax.random.normal(k1, (B, N, D), dtype=jnp.float32)
    out = jax.block_until_ready(base_mp_6_forward(emb, force_pallas=True))
    ref = _reference(emb)
    assert out.shape == (B, N - 1, D), out.shape
    assert jnp.allclose(out, ref, atol=1e-5, rtol=1e-5), "mismatch (small/pallas)"
    out_d = jax.block_until_ready(base_mp_6_forward(emb))
    assert jnp.allclose(out_d, ref, atol=1e-5, rtol=1e-5), "mismatch (small/xla)"

    # 2) Ragged batch tiles (TB=2 over B=5) and ragged lane tiles (TD=256 over
    #    D=320) via a shrunken tile budget.
    B2, N2, D2 = 5, 64, 320
    emb2 = jax.random.normal(k2, (B2, N2, D2), dtype=jnp.float32)
    out2 = jax.block_until_ready(
        base_mp_6_forward(emb2, target_tile_bytes=128 * 1024))
    ref2 = _reference(emb2)
    assert out2.shape == (B2, N2 - 1, D2), out2.shape
    assert jnp.allclose(out2, ref2, atol=1e-5, rtol=1e-5), "mismatch (ragged)"

    # 3) 128-aligned default path; a single-tile problem is force-split so the
    #    grid keeps >= 2 parallel steps (v7x megacore).
    B3, N3, D3 = 4, 128, 256
    emb3 = jax.random.normal(k3, (B3, N3, D3), dtype=jnp.float32)
    out3 = jax.block_until_ready(base_mp_6_forward(emb3))
    ref3 = _reference(emb3)
    assert out3.shape == (B3, N3 - 1, D3), out3.shape
    assert jnp.allclose(out3, ref3, atol=1e-5, rtol=1e-5), "mismatch (aligned)"

    print("KERNEL_OK")
</pallas_src>

<mosaic_0001>
module attributes {stable_mosaic.version = 11 : i64} {
  func.func @_mp_kernel(%arg0: i32, %arg1: i32, %arg2: memref<1x8x32xf32, #tpu.memory_space<vmem>>, %arg3: memref<1x7x32xf32, #tpu.memory_space<vmem>>) attributes {dimension_semantics = [#tpu.dimension_semantics<parallel>, #tpu.dimension_semantics<parallel>], iteration_bounds = array<i64: 2, 1>, scalar_prefetch = 0 : i64, scratch_operands = 0 : i64, tpu.core_type = #tpu.core_type<tc>, window_params = [{transform_indices = @transform_0, window_bounds = array<i64: 1, 8, 32>}, {transform_indices = @transform_1, window_bounds = array<i64: 1, 7, 32>}]} {
    %c0 = arith.constant 0 : index
    %c0_0 = arith.constant 0 : index
    %c0_1 = arith.constant 0 : index
    %0 = vector.load %arg2[%c0, %c0_0, %c0_1] : memref<1x8x32xf32, #tpu.memory_space<vmem>>, vector<1x8x32xf32>
    %cst = arith.constant dense<0.000000e+00> : vector<1x32xf32>
    %1 = vector.multi_reduction <add>, %0, %cst [1] : vector<1x8x32xf32> to vector<1x32xf32>
    %2 = vector.shape_cast %1 : vector<1x32xf32> to vector<1x1x32xf32>
    %cst_2 = arith.constant 8.000000e+00 : f32
    %3 = vector.broadcast %cst_2 : f32 to vector<1x1x32xf32>
    %4 = arith.divf %2, %3 : vector<1x1x32xf32>
    %5 = vector.extract_strided_slice %0 {offsets = [0, 1, 0], sizes = [1, 7, 32], strides = [1, 1, 1]} : vector<1x8x32xf32> to vector<1x7x32xf32>
    %6 = vector.broadcast %4 : vector<1x1x32xf32> to vector<1x7x32xf32>
    %7 = arith.mulf %5, %6 : vector<1x7x32xf32>
    %cst_3 = arith.constant 0.000000e+00 : f32
    %8 = vector.broadcast %cst_3 : f32 to vector<1x7x32xf32>
    %9 = arith.cmpf oge, %7, %8 : vector<1x7x32xf32>
    %cst_4 = arith.constant 0.00999999977 : f32
    %10 = vector.broadcast %cst_4 : f32 to vector<1x7x32xf32>
    %11 = arith.mulf %10, %7 : vector<1x7x32xf32>
    %12 = arith.select %9, %7, %11 : vector<1x7x32xi1>, vector<1x7x32xf32>
    %c0_5 = arith.constant 0 : index
    %c0_6 = arith.constant 0 : index
    %c0_7 = arith.constant 0 : index
    %13 = vector.load %arg3[%c0_5, %c0_6, %c0_7] : memref<1x7x32xf32, #tpu.memory_space<vmem>>, vector<1x7x32xf32>
    tpu.vector_store %arg3[%c0_5, %c0_6, %c0_7], %12 {strides = array<i32>} : memref<1x7x32xf32, #tpu.memory_space<vmem>>, vector<1x7x32xf32>,
    return
  }
  func.func @transform_0(%arg0: i32, %arg1: i32) -> (i32, i32, i32) {
    %c0_i32 = arith.constant 0 : i32
    %c0_i32_0 = arith.constant 0 : i32
    return %arg0, %c0_i32, %arg1 : i32, i32, i32
  }
  func.func @transform_1(%arg0: i32, %arg1: i32) -> (i32, i32, i32) {
    %c0_i32 = arith.constant 0 : i32
    %c0_i32_0 = arith.constant 0 : i32
    return %arg0, %c0_i32, %arg1 : i32, i32, i32
  }
}

</mosaic_0001>

<bundles_post_ra>
// kernel: tpu_custom_call.1
= control target key start
LH: loop header
LB: loop body
LE: loop exit
PB: predicated region body
PF: predicated region fallthrough
CT: control target
= control target key end

     0   :  { %6 = vsyncpa [#allocation3], 0  ;;  %s513_s0 = inlined_call_operand.hbm [shape: f32[2,8,32], index: 0, kind: input, shape index: {}]   ;;  %s514_s1 = inlined_call_operand.vmem [shape: f32[2,7,32], index: 1, kind: output, shape index: {}]  }
   0x1   :  { %8 = vsyncpa [#allocation3 + $0x1], 0  ;;  %s413_s6 = smov 0   ;;  %s415_s7 = smov 0  }
   0x2   :  { %s417_s8 = smov 0   ;;  %s419_s9 = smov 0  }
   0x3   :  { %s421_s10 = smov 0   ;;  %s423_s11 = smov 0  }
   0x4 LB: > { %s256_s12 = sadd.s32 4294967295, %s400_s11   ;;  %s26_s13 = sadd.s32 1, %s396_s10  ;;  %s400_s11 = sphi %s423_s11, %s14_s11   ;;  %s396_s10 = sphi %s421_s10, %s522_s10   ;;  %s392_s9 = sphi %s419_s9, %s521_s9   ;;  %s388_s8 = sphi %s417_s8, %s520_s8   ;;  %s384_s7 = sphi %s415_s7, %s519_s7   ;;  %s380_s6 = sphi %s413_s6, %s518_s6  }
   0x5   : > { %p28_p0 = scmp.ge.s32.totalorder %s26_s13, 2  ;;  %s35_s14 = sadd.s32 1, %s388_s8 }
   0x6   : > { %p42_p1 = scmp.ne.s32.totalorder %s388_s8, %s384_s7  ;;  %p43_p2 = scmp.eq.s32.totalorder %s400_s11, 0 }
   0x7   : > { %s524_s13 = smov (%p28_p0, %s26_s13), 0  ;;  %p48_p4 = scmp.ne.s32.totalorder %s384_s7, %s380_s6 }
   0x8   : > { %p449_p3 = por %p43_p2, %p42_p1  ;;  %s30_s16 = ssub.s32 %s396_s10, %s524_s13 }
   0x9   : > { %p49_p5 = scmp.eq.s32.totalorder %s256_s12, 0  ;;  %p33_p6 = scmp.eq.s32.totalorder %s30_s16, 0 }
   0xa   : > { %p273_p8 = scmp.lt.s32.totalorder %s400_s11, 2  ;;  %s100_s19 = sand.u32 1, %s388_s8  }
   0xb   : > { %p456_p7 = por %p49_p5, %p48_p4  ;;  %s261_s20 = sshll.u32 %s396_s10, 7 }
   0xc   : > { %s462_s18 = scalar_select %p33_p6, %s388_s8, %s35_s14  }
   0xd   : > { %s260_s21 = sshll.u32 %s100_s19, 3  ;;  %s110_s24 = scalar_lea.hbm %s513_s0, %s261_s20 }
   0xe   : > { %s104_s25 = scalar_lea.vmem [#allocation2], %s260_s21  ;;  %p471_p9 = pnand %p273_p8, %p449_p3 }
   0xf   : > { %s112_s26 = sshll.u32 %s104_s25, 4  ;;  %p262_p10 = scmp.ge.s32.totalorder %s400_s11, 1  ;;  %s113_s26 = int_to_ptr.vmem [resolvable:$true] %s112_s26 }
  0x10   : > { %p117_p11 = scmp.lt.s32.totalorder %s400_s11, 3  ;;  %s101_s28 = scalar_lea.sflag [#allocation3], %s100_s19 }
  0x11   : > { %p324_p12 = pneg %p471_p9  ;;  %s335_s29 = scalar_lea.vmem %s113_s26, 128 }
  0x12   : > { %p336_p13 = scmp.ne.s32.totalorder %s113_s26, %s335_s29  ;;  %s402_s30 = smov [#allocation2]  }
  0x13   : > { %s340_s2 = sshll.u32 %s402_s30, 4  ;;  %s341_s2 = int_to_ptr.vmem [resolvable:$false] %s340_s2 }
  0x14   : > { %p338_p0 = pnand %p336_p13, %p324_p12  ;;  %s342_s3 = scalar_lea.vmem %s341_s2, 256 }
  0x15   : > { %p343_p2 = scmp.lt.s32.totalorder %s113_s26, %s341_s2  ;;  %p344_p3 = scmp.lt.s32.totalorder %s342_s3, %s335_s29 }
  0x16   : > { %p339_p1 = pneg %p338_p0 }
  0x17   : > { %p345_p4 = por %p344_p3, %p343_p2 }
  0x19   : > { %p346_p5 = pnand %p345_p4, %p339_p1 }
  0x1b   : > { %349 = shalt.err (!%p346_p5)
}
  0x1c   : > { %272 = dma.hbm_to_vmem [thread:$0]  (!%p471_p9), %s110_s24, 128, %s113_s26, %s101_s28  }
  0x1d   : > { %p118_p6 = pnand %p262_p10, %p117_p11 }
  0x1e   : > { %s123_s4 = sand.u32 (!%p118_p6), 1, %s384_s7  }
  0x1f   : > { %121 = sbr.rel (%p118_p6) target bundleno = 59 (0x3b), region = 24  ;;  %s263_s5 = sshll.u32 (!%p118_p6), %s123_s4, 3 }
  0x20   : > { %s124_s6 = scalar_lea.sflag (!%p118_p6), [#allocation3], %s123_s4  ;;  %s127_s12 = scalar_lea.vmem (!%p118_p6), [#allocation2], %s263_s5 }
  0x24   : > { %375 = dma.done.wait (%p456_p7), %s124_s6, 128  }
  0x25   : > { %377 = vsyncadd (%p456_p7), %s124_s6, 4294967168  ;;  %vm156_vm0 = vcmask 261120   ;;  %v155_v0 = vld [vmem:[%s127_s12] sm:$0xff]  ;;  %p148_p8 = scmp.lt.s32.totalorder %s392_s9, 1  ;;  %vm170_vm2 = vcmask 261121  }
  0x26   : > { %v157_v1 = vsel %vm156_vm0, %v155_v0, 0.0 }
  0x27   : > { %v158_v2 = vrot.slane %v157_v1, 4  ;;  %s526_s9 = smov (!%p148_p8, %s392_s9), 1 }
  0x28   : > { %s264_s14 = sshll.u32 %s526_s9, 3 }
  0x29   : > { %v159_v3 = vadd.f32 %v158_v2, %v157_v1  ;;  %s154_s17 = scalar_lea.vmem %s514_s1, %s264_s14 }
  0x2b   : > { %v160_v4 = vrot.slane %v159_v3, 2 }
  0x2d   : > { %v161_v5 = vadd.f32 %v160_v4, %v159_v3 }
  0x2f   : > { %v162_v6 = vrot.slane %v161_v5, 1 }
  0x31   : > { %v163_v7 = vadd.f32 %v162_v6, %v161_v5 }
  0x33   : > { %v165_v8 = vmul.f32 0.125, %v163_v7 }
  0x35   : > { %v166_v9 = vmul.f32 %v165_v8, %v155_v0 }
  0x37   : > { %vm167_vm1 = vcmp.ge.f32.partialorder %v166_v9, 0.0  ;;  %v168_v10 = vmul.f32 0.01, %v166_v9 }
  0x39   : > { %v169_v11 = vsel %vm167_vm1, %v166_v9, %v168_v10 }
  0x3a   : > { %171 = vst.msk [vmem:[%s154_s17 - $0x1] sm:$0xfe] %vm170_vm2, %v169_v11 }
  0x3b PF: > { %s14_s11 = sadd.s32 1, %s400_s11   ;;  %s518_s6 = smov %s384_s7 }
  0x3c   : > { %p11_p7 = scmp.ge.s32.totalorder %s14_s11, 4   ;;  %s519_s7 = smov %s388_s8 }
  0x3d   : > { %s520_s8 = smov %s462_s18  ;;  %s521_s9 = smov %s396_s10 }
  0x3e   : > { %s522_s10 = smov %s524_s13  ;;  %13 = sbr.rel (!%p11_p7) target bundleno = 4 (0x4), region = 64 }
  0x43   :  { %197 = vsyncpa [#allocation3], 1 }
  0x44   :  { %199 = vsyncpa [#allocation3 + $0x1], 1 }

</bundles_post_ra>
